<compile_context>
chip_gen: v7x
topology: tpu7x:2x2x1
jax: 0.10.0
libtpu: 0.0.40
codegen_flags: <defaults>
</compile_context>

<pallas_src>
import jax
import jax.numpy as jnp
from jax.experimental import pallas as pl
from jax.experimental.pallas import tpu as pltpu


def bunny_mlp_kernel(x_ref,
                     w_in_ref, b_in_ref,
                     w_h1_ref, b_h1_ref,
                     w_out_ref, b_out_ref,
                     o_ref):
    """One batch tile (batch on the lane axis) of the full fused forward pass."""
    x = x_ref[...].astype(jnp.float32)                      # [in_c, tile_b]

    # h_1 = tanh(input_l(X))
    h1 = jnp.tanh(
        jnp.dot(w_in_ref[...], x, preferred_element_type=jnp.float32)
        + b_in_ref[...])                                    # [first_hidden, tile_b]

    # h_2 = tanh(hidden_l_1(h_1))
    h2 = jnp.tanh(
        jnp.dot(w_h1_ref[...], h1, preferred_element_type=jnp.float32)
        + b_h1_ref[...])                                    # [second_hidden, tile_b]

    # h_3 = tanh(hidden_l_1(h_2))   <- same layer applied again, as in the reference
    h3 = jnp.tanh(
        jnp.dot(w_h1_ref[...], h2, preferred_element_type=jnp.float32)
        + b_h1_ref[...])                                    # [second_hidden, tile_b]

    # y = output_l(h_3)
    y = (jnp.dot(w_out_ref[...], h3, preferred_element_type=jnp.float32)
         + b_out_ref[...])                                  # [out_c, tile_b]

    o_ref[...] = y.astype(o_ref.dtype)


def _round_up(a, m):
    return ((a + m - 1) // m) * m


def bunny_forward(x, params, *, tile_b=1024, io_dtype=None):
    """x: [N, in_channels]. params: PyTorch-layout weights W=[out,in], b=[out,1].

    Returns [N, out_channels] in x.dtype. Pads the batch to the lane tile and
    slices it back off, so any batch size works.
    """
    N, in_c = x.shape
    first_hidden = params["w_in"].shape[0]
    second_hidden = params["w_h1"].shape[0]
    out_c = params["w_out"].shape[0]

    # ---- choose the lane tile (multiple of 128, capped to padded batch) ----
    tile_b = max(128, (int(tile_b) // 128) * 128)
    tile_b = min(tile_b, _round_up(N, 128))
    n_pad = _round_up(N, tile_b)
    # Keep >= 2 parallel grid steps when the batch allows (v7x has 2 TCs/chip).
    if n_pad // tile_b < 2 and n_pad >= 256:
        tile_b = max(128, ((n_pad // 2) // 128) * 128)
        n_pad = _round_up(N, tile_b)
    n_steps = n_pad // tile_b

    # ---- layout flip: batch on the lane axis, optional bf16 streaming ----
    x_dtype = io_dtype if io_dtype is not None else x.dtype
    xt = jnp.zeros((in_c, n_pad), x_dtype).at[:, :N].set(x.T.astype(x_dtype))

    full = lambda i: (0, 0)  # weights/biases: same (whole, resident) block every step
    grid_spec = pltpu.PrefetchScalarGridSpec(
        num_scalar_prefetch=0,
        grid=(n_steps,),
        in_specs=[
            pl.BlockSpec((in_c, tile_b), lambda i: (0, i)),        # X tile
            pl.BlockSpec((first_hidden, in_c), full),              # w_in
            pl.BlockSpec((first_hidden, 1), full),                 # b_in
            pl.BlockSpec((second_hidden, first_hidden), full),     # w_h1
            pl.BlockSpec((second_hidden, 1), full),                # b_h1
            pl.BlockSpec((out_c, second_hidden), full),            # w_out
            pl.BlockSpec((out_c, 1), full),                        # b_out
        ],
        out_specs=pl.BlockSpec((out_c, tile_b), lambda i: (0, i)),
    )

    # Advisory cost estimate for the XLA scheduler.
    flops = 2 * n_pad * (in_c * first_hidden
                         + 2 * first_hidden * second_hidden
                         + second_hidden * out_c)
    transcendentals = n_pad * (first_hidden + 2 * second_hidden)
    w_bytes = sum(int(params[k].size) * params[k].dtype.itemsize
                  for k in ("w_in", "b_in", "w_h1", "b_h1", "w_out", "b_out"))
    bytes_accessed = int(xt.size) * xt.dtype.itemsize + n_pad * out_c * 4 + w_bytes

    yt = pl.pallas_call(
        bunny_mlp_kernel,
        out_shape=jax.ShapeDtypeStruct((out_c, n_pad), jnp.float32),
        grid_spec=grid_spec,
        compiler_params=pltpu.CompilerParams(
            dimension_semantics=("parallel",),
            vmem_limit_bytes=32 * 1024 * 1024),   # sized well inside v7x's 64 MiB VMEM
        cost_estimate=pl.CostEstimate(
            flops=int(flops),
            transcendentals=int(transcendentals),
            bytes_accessed=int(bytes_accessed)),
    )(xt,
      params["w_in"], params["b_in"],
      params["w_h1"], params["b_h1"],
      params["w_out"], params["b_out"])

    return yt[:, :N].T.astype(x.dtype)


def init_params(key, in_channels, first_hidden, second_hidden, out_channels):
    """PyTorch nn.Linear layout: W = [out_features, in_features], b = [out_features, 1]."""
    ks = jax.random.split(key, 8)

    def lin(kw, kb, fan_in, fan_out):
        bound = 1.0 / jnp.sqrt(jnp.float32(fan_in))
        w = jax.random.uniform(kw, (fan_out, fan_in), jnp.float32, -bound, bound)
        b = jax.random.uniform(kb, (fan_out, 1), jnp.float32, -bound, bound)
        return w, b

    w_in, b_in = lin(ks[0], ks[1], in_channels, first_hidden)
    w_h1, b_h1 = lin(ks[2], ks[3], first_hidden, second_hidden)
    # hidden_l_2 exists in __init__ but is never used in forward(); created for parity.
    w_h2, b_h2 = lin(ks[4], ks[5], second_hidden, second_hidden)
    w_out, b_out = lin(ks[6], ks[7], second_hidden, out_channels)
    return {"w_in": w_in, "b_in": b_in,
            "w_h1": w_h1, "b_h1": b_h1,
            "w_h2": w_h2, "b_h2": b_h2,   # unused (matches reference forward)
            "w_out": w_out, "b_out": b_out}


def bunny_reference(x, p):
    h1 = jnp.tanh(x @ p["w_in"].T + p["b_in"].T)
    h2 = jnp.tanh(h1 @ p["w_h1"].T + p["b_h1"].T)
    h3 = jnp.tanh(h2 @ p["w_h1"].T + p["b_h1"].T)
    return h3 @ p["w_out"].T + p["b_out"].T


if __name__ == "__main__":
    in_channels, first_hidden, second_hidden, out_channels = 4, 32, 32, 3
    batch = 16

    key = jax.random.PRNGKey(0)
    k_x, k_p = jax.random.split(key)
    x = jax.random.normal(k_x, (batch, in_channels), jnp.float32)
    params = init_params(k_p, in_channels, first_hidden, second_hidden, out_channels)

    y_ref = bunny_reference(x, params)

    # f32 I/O path (tight check).
    y = bunny_forward(x, params)
    y = jax.block_until_ready(y)
    assert y.shape == (batch, out_channels)
    assert jnp.allclose(y, y_ref, atol=1e-5, rtol=1e-5), "f32 mismatch vs reference"

    # bf16-streamed X (memory-bound path on large batches); loose check.
    y_bf16 = bunny_forward(x, params, io_dtype=jnp.bfloat16)
    y_bf16 = jax.block_until_ready(y_bf16)
    assert jnp.allclose(y_bf16, y_ref, atol=5e-2, rtol=5e-2), "bf16 mismatch vs reference"

    print("KERNEL_OK")
</pallas_src>

<mosaic_0001>
module attributes {stable_mosaic.version = 11 : i64} {
  func.func @bunny_mlp_kernel(%arg0: i32, %arg1: memref<4x128xf32, #tpu.memory_space<vmem>>, %arg2: memref<32x4xf32, #tpu.memory_space<vmem>>, %arg3: memref<32x1xf32, #tpu.memory_space<vmem>>, %arg4: memref<32x32xf32, #tpu.memory_space<vmem>>, %arg5: memref<32x1xf32, #tpu.memory_space<vmem>>, %arg6: memref<3x32xf32, #tpu.memory_space<vmem>>, %arg7: memref<3x1xf32, #tpu.memory_space<vmem>>, %arg8: memref<3x128xf32, #tpu.memory_space<vmem>>) attributes {dimension_semantics = [#tpu.dimension_semantics<parallel>], iteration_bounds = array<i64: 1>, scalar_prefetch = 0 : i64, scratch_operands = 0 : i64, tpu.core_type = #tpu.core_type<tc>, window_params = [{transform_indices = @transform_0, window_bounds = array<i64: 4, 128>}, {pipeline_mode = #tpu.pipeline_mode<synchronous>, transform_indices = @transform_1, window_bounds = array<i64: 32, 4>}, {pipeline_mode = #tpu.pipeline_mode<synchronous>, transform_indices = @transform_2, window_bounds = array<i64: 32, 1>}, {pipeline_mode = #tpu.pipeline_mode<synchronous>, transform_indices = @transform_3, window_bounds = array<i64: 32, 32>}, {pipeline_mode = #tpu.pipeline_mode<synchronous>, transform_indices = @transform_4, window_bounds = array<i64: 32, 1>}, {pipeline_mode = #tpu.pipeline_mode<synchronous>, transform_indices = @transform_5, window_bounds = array<i64: 3, 32>}, {pipeline_mode = #tpu.pipeline_mode<synchronous>, transform_indices = @transform_6, window_bounds = array<i64: 3, 1>}, {transform_indices = @transform_7, window_bounds = array<i64: 3, 128>}]} {
    %c0 = arith.constant 0 : index
    %c0_0 = arith.constant 0 : index
    %0 = vector.load %arg1[%c0, %c0_0] : memref<4x128xf32, #tpu.memory_space<vmem>>, vector<4x128xf32>
    %c0_1 = arith.constant 0 : index
    %c0_2 = arith.constant 0 : index
    %1 = vector.load %arg2[%c0_1, %c0_2] : memref<32x4xf32, #tpu.memory_space<vmem>>, vector<32x4xf32>
    %cst = arith.constant dense<0.000000e+00> : vector<32x128xf32>
    %2 = tpu.matmul %1, %0, %cst {dimension_numbers = #tpu.dot_dimension_numbers<[1], [0], [0], [1], [0, 0, 1, 1], [], []>} : vector<32x4xf32>, vector<4x128xf32>, vector<32x128xf32> -> vector<32x128xf32>
    %c0_3 = arith.constant 0 : index
    %c0_4 = arith.constant 0 : index
    %3 = vector.load %arg3[%c0_3, %c0_4] : memref<32x1xf32, #tpu.memory_space<vmem>>, vector<32x1xf32>
    %4 = vector.broadcast %3 : vector<32x1xf32> to vector<32x128xf32>
    %5 = arith.addf %2, %4 : vector<32x128xf32>
    %6 = math.tanh %5 : vector<32x128xf32>
    %c0_5 = arith.constant 0 : index
    %c0_6 = arith.constant 0 : index
    %7 = vector.load %arg4[%c0_5, %c0_6] : memref<32x32xf32, #tpu.memory_space<vmem>>, vector<32x32xf32>
    %cst_7 = arith.constant dense<0.000000e+00> : vector<32x128xf32>
    %8 = tpu.matmul %7, %6, %cst_7 {dimension_numbers = #tpu.dot_dimension_numbers<[1], [0], [0], [1], [0, 0, 1, 1], [], []>} : vector<32x32xf32>, vector<32x128xf32>, vector<32x128xf32> -> vector<32x128xf32>
    %c0_8 = arith.constant 0 : index
    %c0_9 = arith.constant 0 : index
    %9 = vector.load %arg5[%c0_8, %c0_9] : memref<32x1xf32, #tpu.memory_space<vmem>>, vector<32x1xf32>
    %10 = vector.broadcast %9 : vector<32x1xf32> to vector<32x128xf32>
    %11 = arith.addf %8, %10 : vector<32x128xf32>
    %12 = math.tanh %11 : vector<32x128xf32>
    %c0_10 = arith.constant 0 : index
    %c0_11 = arith.constant 0 : index
    %13 = vector.load %arg4[%c0_10, %c0_11] : memref<32x32xf32, #tpu.memory_space<vmem>>, vector<32x32xf32>
    %cst_12 = arith.constant dense<0.000000e+00> : vector<32x128xf32>
    %14 = tpu.matmul %13, %12, %cst_12 {dimension_numbers = #tpu.dot_dimension_numbers<[1], [0], [0], [1], [0, 0, 1, 1], [], []>} : vector<32x32xf32>, vector<32x128xf32>, vector<32x128xf32> -> vector<32x128xf32>
    %c0_13 = arith.constant 0 : index
    %c0_14 = arith.constant 0 : index
    %15 = vector.load %arg5[%c0_13, %c0_14] : memref<32x1xf32, #tpu.memory_space<vmem>>, vector<32x1xf32>
    %16 = vector.broadcast %15 : vector<32x1xf32> to vector<32x128xf32>
    %17 = arith.addf %14, %16 : vector<32x128xf32>
    %18 = math.tanh %17 : vector<32x128xf32>
    %c0_15 = arith.constant 0 : index
    %c0_16 = arith.constant 0 : index
    %19 = vector.load %arg6[%c0_15, %c0_16] : memref<3x32xf32, #tpu.memory_space<vmem>>, vector<3x32xf32>
    %cst_17 = arith.constant dense<0.000000e+00> : vector<3x128xf32>
    %20 = tpu.matmul %19, %18, %cst_17 {dimension_numbers = #tpu.dot_dimension_numbers<[1], [0], [0], [1], [0, 0, 1, 1], [], []>} : vector<3x32xf32>, vector<32x128xf32>, vector<3x128xf32> -> vector<3x128xf32>
    %c0_18 = arith.constant 0 : index
    %c0_19 = arith.constant 0 : index
    %21 = vector.load %arg7[%c0_18, %c0_19] : memref<3x1xf32, #tpu.memory_space<vmem>>, vector<3x1xf32>
    %22 = vector.broadcast %21 : vector<3x1xf32> to vector<3x128xf32>
    %23 = arith.addf %20, %22 : vector<3x128xf32>
    %c0_20 = arith.constant 0 : index
    %c0_21 = arith.constant 0 : index
    %24 = vector.load %arg8[%c0_20, %c0_21] : memref<3x128xf32, #tpu.memory_space<vmem>>, vector<3x128xf32>
    tpu.vector_store %arg8[%c0_20, %c0_21], %23 {strides = array<i32>} : memref<3x128xf32, #tpu.memory_space<vmem>>, vector<3x128xf32>,
    return
  }
  func.func @transform_0(%arg0: i32) -> (i32, i32) {
    %c0_i32 = arith.constant 0 : i32
    %c0_i32_0 = arith.constant 0 : i32
    return %c0_i32, %arg0 : i32, i32
  }
  func.func @transform_1(%arg0: i32) -> (i32, i32) {
    %c0_i32 = arith.constant 0 : i32
    %c0_i32_0 = arith.constant 0 : i32
    %c0_i32_1 = arith.constant 0 : i32
    return %c0_i32, %c0_i32_0 : i32, i32
  }
  func.func @transform_2(%arg0: i32) -> (i32, i32) {
    %c0_i32 = arith.constant 0 : i32
    %c0_i32_0 = arith.constant 0 : i32
    %c0_i32_1 = arith.constant 0 : i32
    return %c0_i32, %c0_i32_0 : i32, i32
  }
  func.func @transform_3(%arg0: i32) -> (i32, i32) {
    %c0_i32 = arith.constant 0 : i32
    %c0_i32_0 = arith.constant 0 : i32
    %c0_i32_1 = arith.constant 0 : i32
    return %c0_i32, %c0_i32_0 : i32, i32
  }
  func.func @transform_4(%arg0: i32) -> (i32, i32) {
    %c0_i32 = arith.constant 0 : i32
    %c0_i32_0 = arith.constant 0 : i32
    %c0_i32_1 = arith.constant 0 : i32
    return %c0_i32, %c0_i32_0 : i32, i32
  }
  func.func @transform_5(%arg0: i32) -> (i32, i32) {
    %c0_i32 = arith.constant 0 : i32
    %c0_i32_0 = arith.constant 0 : i32
    %c0_i32_1 = arith.constant 0 : i32
    return %c0_i32, %c0_i32_0 : i32, i32
  }
  func.func @transform_6(%arg0: i32) -> (i32, i32) {
    %c0_i32 = arith.constant 0 : i32
    %c0_i32_0 = arith.constant 0 : i32
    %c0_i32_1 = arith.constant 0 : i32
    return %c0_i32, %c0_i32_0 : i32, i32
  }
  func.func @transform_7(%arg0: i32) -> (i32, i32) {
    %c0_i32 = arith.constant 0 : i32
    %c0_i32_0 = arith.constant 0 : i32
    return %c0_i32, %arg0 : i32, i32
  }
}

</mosaic_0001>

<bundles_post_ra>
// kernel: tpu_custom_call.1
= control target key start
LH: loop header
LB: loop body
LE: loop exit
PB: predicated region body
PF: predicated region fallthrough
CT: control target
= control target key end

     0   :  { %vm69_vm0 = vcmask 1043456   ;;  %vm56_vm1 = vcmask 31744   ;;  %v640_v5 = vmov 0   ;;  %s767_s0 = inlined_call_operand.vmem [shape: f32[4,128], index: 0, kind: input, shape index: {}]   ;;  %s768_s1 = inlined_call_operand.vmem [shape: f32[32,4], index: 1, kind: input, shape index: {}]   ;;  %s769_s2 = inlined_call_operand.vmem [shape: f32[32,1], index: 2, kind: input, shape index: {}]   ;;  %s770_s3 = inlined_call_operand.vmem [shape: f32[32,32], index: 3, kind: input, shape index: {}]   ;;  %s771_s4 = inlined_call_operand.vmem [shape: f32[32,1], index: 4, kind: input, shape index: {}]   ;;  %s772_s5 = inlined_call_operand.vmem [shape: f32[3,32], index: 5, kind: input, shape index: {}]   ;;  %s773_s6 = inlined_call_operand.vmem [shape: f32[3,1], index: 6, kind: input, shape index: {}]   ;;  %s774_s7 = inlined_call_operand.hbm [shape: f32[3,128], index: 7, kind: output, shape index: {}]  }
   0x1   :  { %v27_v0 = vld [vmem:[%s767_s0] sm:$0xf]  ;;  %v29_v2 = vld [vmem:[%s768_s1 + $0x8] sm:$0xff]  ;;  %v30_v3 = vld [vmem:[%s768_s1 + $0x10] sm:$0xff]  ;;  %590 = vset.pattern.permute.xlu0 %v640_v5  ;;  %591 = vset.pattern.permute.xlu1 %v640_v5 }
   0x2   :  { %v28_v1 = vld [vmem:[%s768_s1] sm:$0xff]  ;;  %516 = vmatprep.subr.msk.mxu0 %vm69_vm0, %v27_v0  ;;  %v34_v6 = vld [vmem:[%s769_s2 + $0x10] sm:$0xff]  ;;  %v31_v7 = vld [vmem:[%s768_s1 + $0x18] sm:$0xff] }
   0x3   :  { %518 = vmatprep.mubr.msk.f32.mxu0 %vm56_vm1, %v28_v1  ;;  %v32_v4 = vld [vmem:[%s769_s2] sm:$0xff]  ;;  %517 = vmatpush3.msk.msra.mxu0 %vm69_vm0, %v27_v0  ;;  %v33_v8 = vld [vmem:[%s769_s2 + $0x8] sm:$0xff] }
   0x4   :  { %519 = vmatmul.mubr.msk.f32.vlgmr.msra.gmra.mrb[0].mxu0 %vm56_vm1, %v29_v2  ;;  %38 = vperm.xlu0 %590, %v32_v4  }
   0x5   :  { %521 = vmatprep.mubr.msk.f32.mxu0 %vm56_vm1, %v30_v3 }
   0x6   :  { %12 = vsyncpa [#allocation3], 0  ;;  %48 = vperm.xlu1 %591, %v34_v6   ;;  %v35_v9 = vld [vmem:[%s769_s2 + $0x18] sm:$0xff]  ;;  %v166_v10 = vld [vmem:[%s771_s4] sm:$0xff]  ;;  %vm190_vm2 = vcmask 261120   ;;  %v641_v55 = vmov 0.0|0.0  }
   0x7   :  { %v167_v11 = vld [vmem:[%s771_s4 + $0x8] sm:$0xff]  ;;  %v168_v12 = vld [vmem:[%s771_s4 + $0x10] sm:$0xff]  ;;  %v169_v13 = vld [vmem:[%s771_s4 + $0x18] sm:$0xff]  ;;  %vm642_vm3 = vmmov 0   ;;  %v643_v56 = vmov 0.0   ;;  %s644_s10 = smov [#allocation2]  }
   0x8   :  { %522 = vmatmul.mubr.msk.f32.gmra.mrb[2].mxu0 %vm56_vm1, %v31_v7  ;;  %43 = vperm.xlu0 %590, %v33_v8   ;;  %v382_v14 = vld [vmem:[%s773_s6] sm:$0x7]  ;;  %v163_v34 = vld [vmem:[%s770_s3 + $0x8] sm:$0xff]  ;;  %v164_v35 = vld [vmem:[%s770_s3 + $0x10] sm:$0xff]  ;;  %s468_s0 = sshll.u32 %s644_s10, 4  ;;  %s469_s0 = int_to_ptr.vmem [resolvable:$true] %s468_s0 }
   0x9   :  { %v162_v15 = vld [vmem:[%s770_s3] sm:$0xff]  ;;  %v165_v36 = vld [vmem:[%s770_s3 + $0x18] sm:$0xff]  ;;  %s616_s11 = scalar_lea.vmem %s469_s0, 64  ;;  %p621_p1 = scmp.lt.s32.totalorder %s469_s0, %s469_s0 }
   0xa   :  { %53 = vperm.xlu1 %591, %v35_v9   ;;  %532 = vmatprep.mubr.msk.f32.mxu1 %vm190_vm2, %v162_v15  ;;  %v381_v7 = vld [vmem:[%s772_s5] sm:$0x7]  ;;  %p617_p0 = scmp.ne.s32.totalorder %s469_s0, %s616_s11  ;;  %p622_p2 = scmp.lt.s32.totalorder %s616_s11, %s616_s11 }
   0xb   :  { %546 = vmatprep.mubr.msk.f32.mxu0 %vm190_vm2, %v162_v15 }
   0xc   :  { %172 = vperm.xlu0 %590, %v166_v10   ;;  %p623_p3 = por %p622_p2, %p621_p1 }
   0xe   :  { %177 = vperm.xlu1 %591, %v167_v11   ;;  %p624_p4 = pnand %p623_p3, %p617_p0 }
  0x10   :  { %182 = vperm.xlu0 %590, %v168_v12  }
  0x12   :  { %187 = vperm.xlu1 %591, %v169_v13  }
  0x14   :  { %385 = vperm.xlu0 %590, %v382_v14  }
  0x83   :  { %v39_v16 = vpop.permute.xlu0 %38 }
  0x85   :  { %v49_v17 = vpop.permute.xlu1 %48 }
  0x87   :  { %v44_v18 = vpop.permute.xlu0 %43 }
  0x89   :  { %v54_v23 = vpop.permute.xlu1 %53 }
  0x8b   :  { %v173_v38 = vpop.permute.xlu0 %172 }
  0x8d   :  { %v178_v37 = vpop.permute.xlu1 %177 }
  0x8f   :  { %v183_v45 = vpop.permute.xlu0 %182 }
  0x91   :  { %v188_v43 = vpop.permute.xlu1 %187 }
  0x93   :  { %v386_v8 = vpop.permute.xlu0 %385 }
  0xd7   :  { %v520_v19 = vpop.f32.mrb[0].mxu0 }
  0xd8   :  { %v145_v20 = vadd.f32 %v520_v19, %v44_v18  ;;  %v139_v21 = vpop.f32.mrb[1].mxu0 }
  0xd9   :  { %v140_v22 = vadd.f32 %v139_v21, %v39_v16 }
  0xda   :  { %592 = vtanh.f32 %v145_v20 }
  0xdb   :  { %594 = vtanh.f32 %v140_v22  ;;  %v523_v24 = vpop.f32.mrb[2].mxu0 }
  0xdc   :  { %v155_v25 = vadd.f32 %v523_v24, %v54_v23  ;;  %v149_v26 = vpop.f32.mrb[3].mxu0 }
  0xdd   :  { %v150_v27 = vadd.f32 %v149_v26, %v49_v17 }
  0xde   :  { %596 = vtanh.f32 %v155_v25 }
  0xdf   :  { %598 = vtanh.f32 %v150_v27 }
  0xe4   :  { %v593_v28 = vpop.eup %592 }
  0xe5   :  { %v595_v29 = vpop.eup %594 }
  0xe6   :  { %v563_v30 = vpack.c.bf16 %v593_v28, %v595_v29 }
  0xe8   :  { %v597_v31 = vpop.eup %596  ;;  %564 = vmatprep.subr.bf16.mxu1 %v563_v30 }
  0xe9   :  { %v599_v32 = vpop.eup %598  ;;  %566 = vmatpush3.bf16.msra.mxu1 %v563_v30 }
  0xea   :  { %v567_v33 = vpack.c.bf16 %v597_v31, %v599_v32 }
  0xec   :  { %568 = vmatprep.subr.bf16.mxu1 %v567_v33 }
  0xed   :  { %570 = vmatpush3.bf16.msra.mxu1 %v567_v33 }
  0xee   :  { %579 = vmatprep.subr.bf16.mxu1 %v641_v55 }
  0xf0   :  { %533 = vmatmul.mubr.msk.f32.vlgmr.msra.gmra.mrb[0].mxu1 %vm190_vm2, %v163_v34 }
  0xf1   :  { %535 = vmatprep.mubr.msk.f32.mxu1 %vm190_vm2, %v164_v35 }
  0xf4   :  { %536 = vmatmul.mubr.msk.f32.gmra.mrb[2].mxu1 %vm190_vm2, %v165_v36 }
  0xf5   :  { %560 = vmatprep.mubr.msk.f32.mxu1 %vm642_vm3, %v643_v56 }
 0x1c3   :  { %v534_v39 = vpop.f32.mrb[0].mxu1 }
 0x1c4   :  { %v275_v40 = vadd.f32 %v534_v39, %v178_v37  ;;  %v269_v41 = vpop.f32.mrb[1].mxu1 }
 0x1c5   :  { %v270_v42 = vadd.f32 %v269_v41, %v173_v38 }
 0x1c6   :  { %600 = vtanh.f32 %v275_v40 }
 0x1c7   :  { %602 = vtanh.f32 %v270_v42  ;;  %v537_v44 = vpop.f32.mrb[2].mxu1 }
 0x1c8   :  { %v285_v46 = vadd.f32 %v537_v44, %v188_v43  ;;  %v279_v47 = vpop.f32.mrb[3].mxu1 }
 0x1c9   :  { %v280_v48 = vadd.f32 %v279_v47, %v183_v45 }
 0x1ca   :  { %604 = vtanh.f32 %v285_v46 }
 0x1cb   :  { %606 = vtanh.f32 %v280_v48 }
 0x1d0   :  { %v601_v49 = vpop.eup %600 }
 0x1d1   :  { %v603_v50 = vpop.eup %602 }
 0x1d2   :  { %v571_v51 = vpack.c.bf16 %v601_v49, %v603_v50 }
 0x1d4   :  { %v605_v52 = vpop.eup %604  ;;  %572 = vmatprep.subr.bf16.mxu0 %v571_v51 }
 0x1d5   :  { %v607_v53 = vpop.eup %606  ;;  %574 = vmatpush3.bf16.msra.mxu0 %v571_v51 }
 0x1d6   :  { %v575_v54 = vpack.c.bf16 %v605_v52, %v607_v53 }
 0x1d8   :  { %576 = vmatprep.subr.bf16.mxu0 %v575_v54 }
 0x1d9   :  { %578 = vmatpush3.bf16.msra.mxu0 %v575_v54 }
 0x1dc   :  { %547 = vmatmul.mubr.msk.f32.vlgmr.msra.gmra.mrb[4].mxu0 %vm190_vm2, %v163_v34 }
 0x1dd   :  { %549 = vmatprep.mubr.msk.f32.mxu0 %vm190_vm2, %v164_v35 }
 0x1e0   :  { %550 = vmatmul.mubr.msk.f32.gmra.mrb[6].mxu0 %vm190_vm2, %v165_v36 }
 0x2af   :  { %v548_v57 = vpop.f32.mrb[4].mxu0 }
 0x2b0   :  { %v364_v58 = vadd.f32 %v548_v57, %v178_v37  ;;  %v358_v59 = vpop.f32.mrb[5].mxu0 }
 0x2b1   :  { %v359_v60 = vadd.f32 %v358_v59, %v173_v38 }
 0x2b2   :  { %608 = vtanh.f32 %v364_v58 }
 0x2b3   :  { %610 = vtanh.f32 %v359_v60  ;;  %v551_v61 = vpop.f32.mrb[6].mxu0 }
 0x2b4   :  { %v374_v62 = vadd.f32 %v551_v61, %v188_v43  ;;  %v368_v63 = vpop.f32.mrb[7].mxu0 }
 0x2b5   :  { %v369_v0 = vadd.f32 %v368_v63, %v183_v45 }
 0x2b6   :  { %612 = vtanh.f32 %v374_v62 }
 0x2b7   :  { %614 = vtanh.f32 %v369_v0 }
 0x2bc   :  { %v609_v1 = vpop.eup %608 }
 0x2bd   :  { %v611_v2 = vpop.eup %610 }
 0x2be   :  { %v580_v3 = vpack.c.bf16 %v609_v1, %v611_v2 }
 0x2c0   :  { %v613_v4 = vpop.eup %612  ;;  %581 = vmatpush3.bf16.msra.mxu1 %v580_v3 }
 0x2c1   :  { %v615_v5 = vpop.eup %614  ;;  %582 = vmatprep.subr.bf16.mxu1 %v641_v55 }
 0x2c2   :  { %v583_v6 = vpack.c.bf16 %v613_v4, %v615_v5 }
 0x2c4   :  { %584 = vmatpush3.bf16.msra.mxu1 %v583_v6 }
 0x2c7   :  { %561 = vmatmul.mubr.msk.f32.vlgmr.msra.gmra.mrb[4].mxu1 %vm190_vm2, %v381_v7 }
 0x39a   :  { %v457_v9 = vpop.f32.mrb[4].mxu1 }
 0x39b   :  { %v458_v10 = vadd.f32 %v457_v9, %v386_v8  ;;  %v562_v11 = vpop.f32.mrb[5].mxu1 }
 0x39d   :  { %461 = vst [vmem:[#allocation2] sm:$0x7] %v458_v10 }
 0x39e   :  { %627 = shalt.err (!%p624_p4)
}
 0x39f   :  { %s628_s5 = scalar_lea.hbm %s774_s7, 64 }
 0x3a0   :  { %p629_p5 = scmp.ne.s32.totalorder %s774_s7, %s628_s5  ;;  %p632_p6 = scmp.lt.u32.totalorder %s628_s5, %s774_s7 }
 0x3a2   :  { %p634_p7 = pnand %p632_p6, %p629_p5 }
 0x3a4   :  { %637 = shalt.err (!%p634_p7)
}
 0x3a5   :  { %471 = dma.vmem_to_hbm [thread:$0]  %s469_s0, 64, %s774_s7, [#allocation3]  }
 0x3a6   :  { %638 = dma.done.wait [#allocation3], 64  }
 0x3a7   :  { %639 = vsyncadd [#allocation3], 4294967232 }
 0x3a8   :  { %475 = vsyncpa [#allocation3], 1 }

</bundles_post_ra>
